<compile_context>
chip_gen: v7x
topology: tpu7x:2x2x1
jax: 0.10.0
libtpu: 0.0.40
codegen_flags: <defaults>
</compile_context>

<pallas_src>
import jax
import jax.numpy as jnp
from jax.experimental import pallas as pl
from jax.experimental.pallas import tpu as pltpu

_LANES = 128
_TARGET_BLOCK_BYTES = 4 * 1024 * 1024  # per-input block size target


def _round_up(x, m):
    return ((x + m - 1) // m) * m


def _make_kld_kernel(rows_per_block, n_rows, n_blocks, steps_per_core, needs_mask, ragged):
    """Builds the kernel body with compile-time constants closed over."""
    groups = rows_per_block // 8

    def kernel(mu_ref, ls_ref, out_ref, acc_ref):
        s = pl.program_id(1)

        @pl.when(s == 0)
        def _init():
            acc_ref[...] = jnp.zeros_like(acc_ref)

        blk = pl.program_id(0) * steps_per_core + s  # global block index

        def do_block(mask_tail):
            mu = mu_ref[...].astype(jnp.float32)     # (R, 128)
            ls = ls_ref[...].astype(jnp.float32)     # (R, 128)
            # '1 +' is folded in analytically by the wrapper.
            term = ls - mu * mu - jnp.exp(ls)        # VPU + one EUP exp per vreg
            if mask_tail:
                # Select (never multiply) away unspecified out-of-bounds block contents.
                row0 = blk * rows_per_block
                row = jax.lax.broadcasted_iota(
                    jnp.int32, (rows_per_block, _LANES), 0) + row0
                term = jnp.where(row < n_rows, term, 0.0)
            # Fold the whole block into an (8, 128) accumulator with pure vreg adds
            # (the reshape does not cross (8,128) tiles, so no XLU / no big VMEM stream).
            acc_ref[...] += jnp.sum(term.reshape(groups, 8, _LANES), axis=0)

        if needs_mask:
            # Mask only the single overhanging block; ragged duplicate steps (blk >= NB)
            # match neither branch and are skipped entirely.
            @pl.when(blk == n_blocks - 1)
            def _tail():
                do_block(True)

            @pl.when(blk < n_blocks - 1)
            def _body():
                do_block(False)
        elif ragged:
            @pl.when(blk < n_blocks)
            def _real():
                do_block(False)
        else:
            do_block(False)

        @pl.when(s == pl.num_programs(1) - 1)
        def _finalize():
            total = jnp.sum(acc_ref[...])            # ~1K-element reduction, once per core
            i = jax.lax.broadcasted_iota(jnp.int32, (8, _LANES), 0)
            j = jax.lax.broadcasted_iota(jnp.int32, (8, _LANES), 1)
            # Partial sum at [0, 0] of this core's output block, zeros elsewhere.
            out_ref[...] = jnp.where((i == 0) & (j == 0), total, 0.0)

    return kernel


def kld_loss(mu, log_sig, *, target_block_bytes=_TARGET_BLOCK_BYTES):
    """mu, log_sig: stacked [L, B, D] arrays (or list/tuple of [B, D] arrays)."""
    if isinstance(mu, (list, tuple)):
        mu = jnp.stack(mu)
    if isinstance(log_sig, (list, tuple)):
        log_sig = jnp.stack(log_sig)
    assert mu.shape == log_sig.shape and mu.ndim == 3
    L, B, D = mu.shape
    E = L * B * D

    # Flatten to a lane-dense (M, 128) element slab (free contiguous reshape).  Zero-pad
    # (rare, at most 1023 elements) so M is a multiple of 8; each pad element contributes
    # exactly -1 (0 - 0 - exp(0)), corrected analytically below.
    pad = (-E) % (8 * _LANES)
    mu_flat = mu.reshape(-1)
    ls_flat = log_sig.reshape(-1)
    if pad:
        mu_flat = jnp.pad(mu_flat, (0, pad))
        ls_flat = jnp.pad(ls_flat, (0, pad))
    M = (E + pad) // _LANES
    mu2 = mu_flat.reshape(M, _LANES)
    ls2 = ls_flat.reshape(M, _LANES)

    # Row-tile sizing: ~target bytes per input block, multiple of 8 sublanes, 128 lanes.
    itemsize = jnp.dtype(mu.dtype).itemsize
    rows = max(8, (target_block_bytes // (_LANES * itemsize)) // 8 * 8)
    R = min(rows, _round_up(M, 8))
    NB = pl.cdiv(M, R)                       # number of row blocks
    P = 2 if NB >= 2 else 1                  # always split across 2 cores when possible
    S = pl.cdiv(NB, P)                       # sequential steps per core
    ragged = (P * S) != NB                   # one duplicate (skipped) step on core 1
    needs_mask = (M % R) != 0                # last block overhangs the row axis

    kernel = _make_kld_kernel(R, M, NB, S, needs_mask, ragged)
    if ragged:
        # Clamp so the auto-pipeline never DMAs past the array; the duplicate step's
        # contribution is skipped inside the kernel.
        in_map = lambda p, s: (jnp.minimum(p * S + s, NB - 1), 0)
    else:
        in_map = lambda p, s: (p * S + s, 0)

    # Only raise the scoped VMEM limit when the double-buffered footprint would not fit the
    # smallest default (v5e 16 MiB); the raised value stays well under v7x's 64 MiB physical.
    block_bytes = R * _LANES * itemsize
    footprint = 4 * block_bytes + 8 * _LANES * 4   # 2 inputs x 2 buffers + accumulator
    cp_kwargs = dict(dimension_semantics=("parallel", "arbitrary"))
    if footprint > 12 * 1024 * 1024:
        cp_kwargs["vmem_limit_bytes"] = footprint + (4 << 20)

    out = pl.pallas_call(
        kernel,
        out_shape=jax.ShapeDtypeStruct((8 * P, _LANES), jnp.float32),
        grid_spec=pltpu.PrefetchScalarGridSpec(
            num_scalar_prefetch=0,
            grid=(P, S),
            in_specs=[
                pl.BlockSpec((R, _LANES), in_map),
                pl.BlockSpec((R, _LANES), in_map),
            ],
            out_specs=pl.BlockSpec((8, _LANES), lambda p, s: (p, 0)),
            scratch_shapes=[pltpu.VMEM((8, _LANES), jnp.float32)],
        ),
        compiler_params=pltpu.CompilerParams(**cp_kwargs),
    )(mu2, ls2)

    # Only out[0::8, 0] is non-zero (one partial per core).  The '1 +' term contributes one
    # per real element (E) and each pad element contributed -1 (undo with +pad); apply the
    # single -(0.5 / B) scale once.  (f32 grand total: exact-integer representation of the
    # analytic constant is lost only past ~2^24 elements — negligible for a loss value.)
    total = jnp.sum(out) + jnp.float32(E + pad)
    return (-(0.5 / B)) * total


def kld_loss_ref(mu_stack, log_sig_stack):
    """Pure-JAX reference mirroring the PyTorch module."""
    total = 0.0
    for i in range(mu_stack.shape[0]):
        m = mu_stack[i].astype(jnp.float32)
        s = log_sig_stack[i].astype(jnp.float32)
        per_sample = 0.5 * jnp.sum(1.0 + s - m ** 2 - jnp.exp(s), axis=1)
        total = total + (-jnp.mean(per_sample, axis=0))
    return jnp.mean(total)


if __name__ == "__main__":
    key = jax.random.PRNGKey(0)
    k1, k2, k3, k4 = jax.random.split(key, 4)

    # Primary small-shape check: list of 2 (mu, log_sig) pairs, each [batch=8, latent=128].
    L, B, D = 2, 8, 128
    mu = jax.random.normal(k1, (L, B, D), dtype=jnp.float32)
    log_sig = 0.1 * jax.random.normal(k2, (L, B, D), dtype=jnp.float32)
    out = jax.block_until_ready(kld_loss(mu, log_sig))
    ref = jax.block_until_ready(kld_loss_ref(mu, log_sig))
    assert jnp.allclose(out, ref, rtol=1e-5, atol=1e-5), (out, ref)

    # Exercise the pl.when-gated tail-mask path + 2-core split with tiny forced blocks.
    mu_b = jax.random.normal(k3, (3, 8, 128), dtype=jnp.float32)
    ls_b = 0.1 * jax.random.normal(k4, (3, 8, 128), dtype=jnp.float32)
    out_b = jax.block_until_ready(kld_loss(mu_b, ls_b, target_block_bytes=16 * 128 * 4))
    ref_b = jax.block_until_ready(kld_loss_ref(mu_b, ls_b))
    assert jnp.allclose(out_b, ref_b, rtol=1e-5, atol=1e-5), (out_b, ref_b)

    # Exercise the ragged 2-core split (odd block count -> clamped index + skipped step).
    out_c = jax.block_until_ready(kld_loss(mu_b, ls_b, target_block_bytes=8 * 128 * 4))
    assert jnp.allclose(out_c, ref_b, rtol=1e-5, atol=1e-5), (out_c, ref_b)

    print("KERNEL_OK")
</pallas_src>

<mosaic_0001>
module attributes {stable_mosaic.version = 11 : i64} {
  func.func @kernel(%arg0: i32, %arg1: i32, %arg2: memref<16x128xf32, #tpu.memory_space<vmem>>, %arg3: memref<16x128xf32, #tpu.memory_space<vmem>>, %arg4: memref<8x128xf32, #tpu.memory_space<vmem>>, %arg5: memref<8x128xf32, #tpu.memory_space<vmem>>) attributes {dimension_semantics = [#tpu.dimension_semantics<parallel>, #tpu.dimension_semantics<arbitrary>], iteration_bounds = array<i64: 1, 1>, scalar_prefetch = 0 : i64, scratch_operands = 1 : i64, tpu.core_type = #tpu.core_type<tc>, window_params = [{transform_indices = @transform_0, window_bounds = array<i64: 16, 128>}, {transform_indices = @transform_1, window_bounds = array<i64: 16, 128>}, {transform_indices = @transform_2, window_bounds = array<i64: 8, 128>}]} {
    %c0_i32 = arith.constant 0 : i32
    %0 = arith.cmpi eq, %arg1, %c0_i32 : i32
    %1 = arith.extui %0 : i1 to i32
    %c0_i32_0 = arith.constant 0 : i32
    %2 = arith.cmpi ne, %1, %c0_i32_0 : i32
    scf.if %2 {
      %cst_10 = arith.constant 0.000000e+00 : f32
      %17 = vector.broadcast %cst_10 : f32 to vector<8x128xf32>
      %c0_11 = arith.constant 0 : index
      %c0_12 = arith.constant 0 : index
      %18 = vector.load %arg5[%c0_11, %c0_12] : memref<8x128xf32, #tpu.memory_space<vmem>>, vector<8x128xf32>
      tpu.vector_store %arg5[%c0_11, %c0_12], %17 {strides = array<i32>} : memref<8x128xf32, #tpu.memory_space<vmem>>, vector<8x128xf32>,
    } else {
    }
    %c0 = arith.constant 0 : index
    %c0_1 = arith.constant 0 : index
    %3 = vector.load %arg2[%c0, %c0_1] : memref<16x128xf32, #tpu.memory_space<vmem>>, vector<16x128xf32>
    %c0_2 = arith.constant 0 : index
    %c0_3 = arith.constant 0 : index
    %4 = vector.load %arg3[%c0_2, %c0_3] : memref<16x128xf32, #tpu.memory_space<vmem>>, vector<16x128xf32>
    %5 = arith.mulf %3, %3 : vector<16x128xf32>
    %6 = arith.subf %4, %5 : vector<16x128xf32>
    %7 = math.exp %4 : vector<16x128xf32>
    %8 = arith.subf %6, %7 : vector<16x128xf32>
    %c0_4 = arith.constant 0 : index
    %c0_5 = arith.constant 0 : index
    %9 = vector.load %arg5[%c0_4, %c0_5] : memref<8x128xf32, #tpu.memory_space<vmem>>, vector<8x128xf32>
    %10 = vector.shape_cast %8 : vector<16x128xf32> to vector<2x8x128xf32>
    %cst = arith.constant dense<0.000000e+00> : vector<8x128xf32>
    %11 = vector.multi_reduction <add>, %10, %cst [0] : vector<2x8x128xf32> to vector<8x128xf32>
    %12 = arith.addf %9, %11 : vector<8x128xf32>
    %c0_6 = arith.constant 0 : index
    %c0_7 = arith.constant 0 : index
    %13 = vector.load %arg5[%c0_6, %c0_7] : memref<8x128xf32, #tpu.memory_space<vmem>>, vector<8x128xf32>
    tpu.vector_store %arg5[%c0_6, %c0_7], %12 {strides = array<i32>} : memref<8x128xf32, #tpu.memory_space<vmem>>, vector<8x128xf32>,
    %c0_i32_8 = arith.constant 0 : i32
    %14 = arith.cmpi eq, %arg1, %c0_i32_8 : i32
    %15 = arith.extui %14 : i1 to i32
    %c0_i32_9 = arith.constant 0 : i32
    %16 = arith.cmpi ne, %15, %c0_i32_9 : i32
    scf.if %16 {
      %c0_10 = arith.constant 0 : index
      %c0_11 = arith.constant 0 : index
      %17 = vector.load %arg5[%c0_10, %c0_11] : memref<8x128xf32, #tpu.memory_space<vmem>>, vector<8x128xf32>
      %18 = vector.shape_cast %17 : vector<8x128xf32> to vector<1x8x128xf32>
      %cst_12 = arith.constant dense<0.000000e+00> : vector<1xf32>
      %19 = vector.multi_reduction <add>, %18, %cst_12 [1, 2] : vector<1x8x128xf32> to vector<1xf32>
      %20 = vector.shape_cast %19 : vector<1xf32> to vector<1x1x1xf32>
      %21 = vector.extract %20[0, 0, 0] : f32 from vector<1x1x1xf32>
      %22 = tpu.iota {dimensions = array<i32: 0>} : vector<8x128xi32>
      %23 = tpu.iota {dimensions = array<i32: 1>} : vector<8x128xi32>
      %c0_i32_13 = arith.constant 0 : i32
      %24 = vector.broadcast %c0_i32_13 : i32 to vector<8x128xi32>
      %25 = arith.cmpi eq, %22, %24 : vector<8x128xi32>
      %c0_i32_14 = arith.constant 0 : i32
      %26 = vector.broadcast %c0_i32_14 : i32 to vector<8x128xi32>
      %27 = arith.cmpi eq, %23, %26 : vector<8x128xi32>
      %28 = arith.andi %25, %27 : vector<8x128xi1>
      %cst_15 = arith.constant 0.000000e+00 : f32
      %29 = vector.broadcast %21 : f32 to vector<8x128xf32>
      %30 = vector.broadcast %cst_15 : f32 to vector<8x128xf32>
      %31 = arith.select %28, %29, %30 : vector<8x128xi1>, vector<8x128xf32>
      %c0_16 = arith.constant 0 : index
      %c0_17 = arith.constant 0 : index
      %32 = vector.load %arg4[%c0_16, %c0_17] : memref<8x128xf32, #tpu.memory_space<vmem>>, vector<8x128xf32>
      tpu.vector_store %arg4[%c0_16, %c0_17], %31 {strides = array<i32>} : memref<8x128xf32, #tpu.memory_space<vmem>>, vector<8x128xf32>,
    } else {
    }
    return
  }
  func.func @transform_0(%arg0: i32, %arg1: i32) -> (i32, i32) {
    %c1_i32 = arith.constant 1 : i32
    %0 = arith.muli %arg0, %c1_i32 : i32
    %1 = arith.addi %0, %arg1 : i32
    %c0_i32 = arith.constant 0 : i32
    %c0_i32_0 = arith.constant 0 : i32
    return %1, %c0_i32 : i32, i32
  }
  func.func @transform_1(%arg0: i32, %arg1: i32) -> (i32, i32) {
    %c1_i32 = arith.constant 1 : i32
    %0 = arith.muli %arg0, %c1_i32 : i32
    %1 = arith.addi %0, %arg1 : i32
    %c0_i32 = arith.constant 0 : i32
    %c0_i32_0 = arith.constant 0 : i32
    return %1, %c0_i32 : i32, i32
  }
  func.func @transform_2(%arg0: i32, %arg1: i32) -> (i32, i32) {
    %c0_i32 = arith.constant 0 : i32
    %c0_i32_0 = arith.constant 0 : i32
    return %arg0, %c0_i32 : i32, i32
  }
}

</mosaic_0001>

<bundles_post_ra>
// kernel: tpu_custom_call.1
= control target key start
LH: loop header
LB: loop body
LE: loop exit
PB: predicated region body
PF: predicated region fallthrough
CT: control target
= control target key end

     0   :  { %7 = vsyncpa [#allocation4], 0  ;;  %s253_s0 = inlined_call_operand.hbm [shape: f32[16,128], index: 0, kind: input, shape index: {}]   ;;  %s254_s1 = inlined_call_operand.hbm [shape: f32[16,128], index: 1, kind: input, shape index: {}]   ;;  %s255_s2 = inlined_call_operand.hbm [shape: f32[8,128], index: 2, kind: output, shape index: {}]  }
   0x1   :  { %8 = vsyncpa [#allocation7], 0 }
   0x2   :  { %9 = vsyncpa [#allocation5], 0  ;;  %s197_s9 = smov [#allocation3]   ;;  %s125_s13 = scalar_lea.hbm %s253_s0, 256 }
   0x3   :  { %s19_s10 = sshll.u32 %s197_s9, 4  ;;  %p126_p0 = scmp.ne.s32.totalorder %s253_s0, %s125_s13  ;;  %s20_s10 = int_to_ptr.vmem [resolvable:$true] %s19_s10 }
   0x4   :  { %p129_p1 = scmp.lt.u32.totalorder %s125_s13, %s253_s0 }
   0x6   :  { %p131_p2 = pnand %p129_p1, %p126_p0 }
   0x8   :  { %134 = shalt.err (!%p131_p2)
}
   0x9   :  { %s135_s18 = scalar_lea.vmem %s20_s10, 256  ;;  %p140_p4 = scmp.lt.s32.totalorder %s20_s10, %s20_s10 }
   0xa   :  { %p136_p3 = scmp.ne.s32.totalorder %s20_s10, %s135_s18  ;;  %p141_p5 = scmp.lt.s32.totalorder %s135_s18, %s135_s18 }
   0xc   :  { %p142_p6 = por %p141_p5, %p140_p4 }
   0xe   :  { %p143_p7 = pnand %p142_p6, %p136_p3 }
  0x10   :  { %146 = shalt.err (!%p143_p7)
}
  0x11   :  { %s198_s19 = smov 128   ;;  %s199_s20 = smov 8  }
  0x12   :  { %25 = dma.hbm_to_vmem [thread:$0]  %s253_s0, 256, %s20_s10, [#allocation4], %s198_s19, %s198_s19, %s199_s20  }
  0x13   :  { %s200_s23 = smov [#allocation6]   ;;  %s147_s27 = scalar_lea.hbm %s254_s1, 256 }
  0x14   :  { %s35_s24 = sshll.u32 %s200_s23, 4  ;;  %p148_p8 = scmp.ne.s32.totalorder %s254_s1, %s147_s27  ;;  %s36_s24 = int_to_ptr.vmem [resolvable:$true] %s35_s24 }
  0x15   :  { %p151_p9 = scmp.lt.u32.totalorder %s147_s27, %s254_s1 }
  0x17   :  { %p153_p10 = pnand %p151_p9, %p148_p8 }
  0x19   :  { %156 = shalt.err (!%p153_p10)
}
  0x1a   :  { %s157_s4 = scalar_lea.vmem %s36_s24, 256  ;;  %p162_p12 = scmp.lt.s32.totalorder %s36_s24, %s36_s24 }
  0x1b   :  { %p158_p11 = scmp.ne.s32.totalorder %s36_s24, %s157_s4  ;;  %p163_p13 = scmp.lt.s32.totalorder %s157_s4, %s157_s4 }
  0x1d   :  { %p164_p0 = por %p163_p13, %p162_p12 }
  0x1f   :  { %p165_p1 = pnand %p164_p0, %p158_p11 }
  0x21   :  { %168 = shalt.err (!%p165_p1)
}
  0x22   :  { %41 = dma.hbm_to_vmem [thread:$0]  %s254_s1, 256, %s36_s24, [#allocation7], %s198_s19, %s198_s19, %s199_s20  }
  0x23   :  { %191 = dma.done.wait [#allocation4], 256  }
  0x24   :  { %192 = vsyncadd [#allocation4], 4294967040 }
  0x25   :  { %193 = dma.done.wait [#allocation7], 256  }
  0x26   :  { %194 = vsyncadd [#allocation7], 4294967040  ;;  %v59_v0 = vld [vmem:[#allocation6] sm:$0xff]  ;;  %v60_v1 = vld [vmem:[#allocation6 + $0x8] sm:$0xff]  ;;  %v88_v22 = vlaneseq  ;;  %s201_s1 = smov [#allocation8]  }
  0x27   :  { %v65_v2 = vmul.f32 1.442695, %v59_v0  ;;  %v67_v3 = vmul.f32 1.442695, %v60_v1  ;;  %v57_v4 = vld [vmem:[#allocation3] sm:$0xff]  ;;  %v58_v5 = vld [vmem:[#allocation3 + $0x8] sm:$0xff] }
  0x28   :  { %v61_v6 = vmul.f32 %v57_v4, %v57_v4  ;;  %v62_v7 = vmul.f32 %v58_v5, %v58_v5  ;;  %v89_v23 = vshrl.u32 %v88_v22, 7  ;;  %v91_v24 = vand.u32 127, %v88_v22  ;;  %s104_s6 = sshll.u32 %s201_s1, 4  ;;  %s105_s6 = int_to_ptr.vmem [resolvable:$true] %s104_s6 }
  0x29   :  { %121 = vpow2.f32 %v65_v2  ;;  %s169_s8 = scalar_lea.vmem %s105_s6, 128  ;;  %p174_p3 = scmp.lt.s32.totalorder %s105_s6, %s105_s6 }
  0x2a   :  { %123 = vpow2.f32 %v67_v3  ;;  %v63_v8 = vsub.f32 %v59_v0, %v61_v6  ;;  %v64_v9 = vsub.f32 %v60_v1, %v62_v7  ;;  %vm92_vm0 = vcmp.eq.s32.totalorder %v89_v23, 0  ;;  %p170_p2 = scmp.ne.s32.totalorder %s105_s6, %s169_s8  ;;  %p175_p4 = scmp.lt.s32.totalorder %s169_s8, %s169_s8 }
  0x2b   :  { %vm93_vm1 = vcmp.eq.s32.totalorder %v91_v24, 0 }
  0x2c   :  { %vm94_vm2 = vmand %vm92_vm0, %vm93_vm1  ;;  %p176_p5 = por %p175_p4, %p174_p3 }
  0x2e   :  { %p177_p6 = pnand %p176_p5, %p170_p2 }
  0x33   :  { %v122_v10 = vpop.eup %121 }
  0x34   :  { %v124_v11 = vpop.eup %123  ;;  %v69_v12 = vsub.f32 %v63_v8, %v122_v10 }
  0x35   :  { %v70_v13 = vsub.f32 %v64_v9, %v124_v11 }
  0x37   :  { %v72_v14 = vadd.f32 %v70_v13, %v69_v12 }
  0x39   :  { %79 = vadd.xlane.f32.xlu0 %v72_v14 }
  0xc6   :  { %v80_v15 = vpop.xlane.xlu0 %79 }
  0xc7   :  { %v81_v16 = vrot.slane %v80_v15, 4 }
  0xc9   :  { %v82_v17 = vadd.f32 %v81_v16, %v80_v15 }
  0xcb   :  { %v83_v18 = vrot.slane %v82_v17, 2 }
  0xcd   :  { %v84_v19 = vadd.f32 %v83_v18, %v82_v17 }
  0xcf   :  { %v85_v20 = vrot.slane %v84_v19, 1 }
  0xd1   :  { %v86_v21 = vadd.f32 %v85_v20, %v84_v19 }
  0xd3   :  { %114 = vpush %v86_v21 }
 0x104   :  { %s115_s7 = spop %114 }
 0x105   :  { %v95_v25 = vstv %s115_s7 }
 0x106   :  { %v96_v26 = vsel %vm94_vm2, %v95_v25, 0.0 }
 0x107   :  { %97 = vst [vmem:[#allocation8] sm:$0xff] %v96_v26 }
 0x108   :  { %180 = shalt.err (!%p177_p6)
}
 0x109   :  { %s181_s11 = scalar_lea.hbm %s255_s2, 128 }
 0x10a   :  { %p182_p7 = scmp.ne.s32.totalorder %s255_s2, %s181_s11  ;;  %p185_p8 = scmp.lt.u32.totalorder %s181_s11, %s255_s2 }
 0x10c   :  { %p187_p9 = pnand %p185_p8, %p182_p7 }
 0x10e   :  { %190 = shalt.err (!%p187_p9)
}
 0x10f   :  { %107 = dma.vmem_to_hbm [thread:$0]  %s105_s6, 128, %s255_s2, [#allocation5]  }
 0x110   :  { %195 = dma.done.wait [#allocation5], 128  }
 0x111   :  { %196 = vsyncadd [#allocation5], 4294967168 }
 0x112   :  { %111 = vsyncpa [#allocation4], 1 }
 0x113   :  { %112 = vsyncpa [#allocation7], 1 }
 0x114   :  { %113 = vsyncpa [#allocation5], 1 }

</bundles_post_ra>
